<compile_context>
chip_gen: v6e
topology: v6e:2x2x1
jax: 0.10.0
libtpu: 0.0.40
codegen_flags: <defaults>
</compile_context>

<pallas_src>
import math

import jax
import jax.numpy as jnp
from jax.experimental import pallas as pl
from jax.experimental.pallas import tpu as pltpu


# ----------------------------------------------------------------------------
# Fused Pallas kernel: one-hot gather (MXU) -> proj1 -> SiLU -> proj2 -> SiLU
# ----------------------------------------------------------------------------
def _diffusion_embedding_kernel(steps_ref, table_ref, w1_ref, b1_ref,
                                w2_ref, b2_ref, o_ref):
    B = o_ref.shape[0]
    S_pad = table_ref.shape[0]

    # One-hot gather on the MXU: (B, S_pad) bf16 x (S_pad, E) bf16 -> (B, E).
    # Each output element selects exactly one table entry, so the result is
    # exact; accumulate f32 then feed bf16 to the next matmul.
    iota = jax.lax.broadcasted_iota(jnp.int32, (B, S_pad), 1)
    one_hot = (iota == steps_ref[...]).astype(jnp.bfloat16)        # (B, S_pad)
    x = jnp.dot(one_hot, table_ref[...],
                preferred_element_type=jnp.float32)                 # (B, E) f32
    x_bf16 = x.astype(jnp.bfloat16)

    # projection1 (bf16 MXU operands, f32 accumulate) + SiLU (exact sigmoid).
    h = jnp.dot(x_bf16, w1_ref[...], preferred_element_type=jnp.float32)
    h = h + b1_ref[...]                                              # (1, P) bcast
    h = h * (1.0 / (1.0 + jnp.exp(-h)))                              # exact SiLU

    # projection2 (bf16 MXU operands, f32 accumulate) + SiLU (approx recip, EUP).
    y = jnp.dot(h.astype(jnp.bfloat16), w2_ref[...],
                preferred_element_type=jnp.float32)
    y = y + b2_ref[...]
    y = y * pl.reciprocal(1.0 + jnp.exp(-y), approx=True)

    o_ref[...] = y.astype(o_ref.dtype)


def diffusion_embedding_forward(diffusion_step, table_bf16, w1, b1, w2, b2):
    """diffusion_step: (B,) int32; table_bf16: (S_pad, E) bf16 (zero-padded rows);
    w1/w2 bf16; b1/b2 (1, P) f32 -> (B, P) f32."""
    B = diffusion_step.shape[0]
    S_pad, E = table_bf16.shape
    P = w1.shape[1]

    # Clamp indices for determinism; OOB rows of the padded table are zeros, so
    # the one-hot gather is graceful either way.
    steps = jnp.clip(diffusion_step, 0, S_pad - 1).astype(jnp.int32)
    steps = steps.reshape(B, 1)                                      # VMEM (B, 1)

    bytes_accessed = (B * 4                     # steps
                      + S_pad * E * 2           # table (bf16)
                      + E * P * 2 + P * 4       # w1, b1
                      + P * P * 2 + P * 4       # w2, b2
                      + B * P * 4)              # out
    cost = pl.CostEstimate(
        flops=2 * B * S_pad * E + 2 * B * E * P + 2 * B * P * P,
        transcendentals=2 * B * P,
        bytes_accessed=bytes_accessed,
    )

    return pl.pallas_call(
        _diffusion_embedding_kernel,
        out_shape=jax.ShapeDtypeStruct((B, P), jnp.float32),
        in_specs=[
            pl.BlockSpec(memory_space=pltpu.MemorySpace.VMEM),   # steps (B, 1) i32
            pl.BlockSpec(memory_space=pltpu.MemorySpace.VMEM),   # table (S_pad, E) bf16
            pl.BlockSpec(memory_space=pltpu.MemorySpace.VMEM),   # w1 (E, P) bf16
            pl.BlockSpec(memory_space=pltpu.MemorySpace.VMEM),   # b1 (1, P) f32
            pl.BlockSpec(memory_space=pltpu.MemorySpace.VMEM),   # w2 (P, P) bf16
            pl.BlockSpec(memory_space=pltpu.MemorySpace.VMEM),   # b2 (1, P) f32
        ],
        out_specs=pl.BlockSpec(memory_space=pltpu.MemorySpace.VMEM),
        cost_estimate=cost,
    )(steps, table_bf16, w1, b1, w2, b2)


# ----------------------------------------------------------------------------
# Module-equivalent setup (deterministic parameter init, embedding table)
# ----------------------------------------------------------------------------
def build_embedding_table(num_steps, half_dim):
    # Mirrors _build_embedding: table[s, j] = s * 10**(j/(half_dim-1)*4)
    steps = jnp.arange(num_steps, dtype=jnp.float32)[:, None]            # (S, 1)
    freqs = 10.0 ** (jnp.arange(half_dim, dtype=jnp.float32)
                     / (half_dim - 1) * 4.0)[None, :]                    # (1, D/2)
    t = steps * freqs
    return jnp.concatenate([jnp.sin(t), jnp.cos(t)], axis=1)             # (S, D)


def pad_table_bf16(table_f32):
    """Cast to bf16 and zero-pad rows up to a multiple of 64 (sublane-friendly,
    keeps the one-hot matmul K dim aligned)."""
    S, E = table_f32.shape
    S_pad = ((S + 63) // 64) * 64
    t = table_f32.astype(jnp.bfloat16)
    if S_pad > S:
        t = jnp.concatenate([t, jnp.zeros((S_pad - S, E), jnp.bfloat16)], axis=0)
    return t


def init_linear(key, in_dim, out_dim):
    # Deterministic PyTorch-style uniform init U(-1/sqrt(in), 1/sqrt(in)).
    kw, kb = jax.random.split(key)
    bound = 1.0 / math.sqrt(in_dim)
    w = jax.random.uniform(kw, (in_dim, out_dim), jnp.float32, -bound, bound)
    b = jax.random.uniform(kb, (1, out_dim), jnp.float32, -bound, bound)
    return w, b


# ----------------------------------------------------------------------------
# Reference (pure JAX, f32) for sanity-check
# ----------------------------------------------------------------------------
def reference(diffusion_step, table, w1, b1, w2, b2):
    x = jnp.take(table, diffusion_step, axis=0)
    x = x @ w1 + b1
    x = x * jax.nn.sigmoid(x)
    x = x @ w2 + b2
    x = x * jax.nn.sigmoid(x)
    return x


if __name__ == "__main__":
    num_steps = 50
    embedding_dim = 128
    projection_dim = 128
    batch = 8

    key = jax.random.PRNGKey(0)
    k_steps, k1, k2 = jax.random.split(key, 3)

    table_f32 = build_embedding_table(num_steps, embedding_dim // 2)  # (50, 128) f32
    table_bf16 = pad_table_bf16(table_f32)                            # (64, 128) bf16
    w1_f32, b1 = init_linear(k1, embedding_dim, projection_dim)
    w2_f32, b2 = init_linear(k2, projection_dim, projection_dim)

    # bf16 matmul operands for the MXU (f32 accumulation inside the kernel).
    w1 = w1_f32.astype(jnp.bfloat16)
    w2 = w2_f32.astype(jnp.bfloat16)

    diffusion_step = jax.random.randint(k_steps, (batch,), 0, num_steps,
                                        dtype=jnp.int32)

    out = diffusion_embedding_forward(diffusion_step, table_bf16, w1, b1, w2, b2)
    out = jax.block_until_ready(out)

    ref = reference(diffusion_step, table_f32, w1_f32, b1, w2_f32, b2)
    assert out.shape == (batch, projection_dim)
    # bf16 table/weights + approx reciprocal on the final SiLU => loosened tol.
    assert jnp.allclose(out, ref, atol=2e-2, rtol=2e-2), "mismatch vs reference"

    print("KERNEL_OK")
</pallas_src>

<mosaic_0001>
module attributes {stable_mosaic.version = 11 : i64} {
  func.func @_diffusion_embedding_kernel(%arg0: memref<8x1xi32, #tpu.memory_space<vmem>>, %arg1: memref<64x128xbf16, #tpu.memory_space<vmem>>, %arg2: memref<128x128xbf16, #tpu.memory_space<vmem>>, %arg3: memref<1x128xf32, #tpu.memory_space<vmem>>, %arg4: memref<128x128xbf16, #tpu.memory_space<vmem>>, %arg5: memref<1x128xf32, #tpu.memory_space<vmem>>, %arg6: memref<8x128xf32, #tpu.memory_space<vmem>>) attributes {dimension_semantics = [], scalar_prefetch = 0 : i64, scratch_operands = 0 : i64, tpu.core_type = #tpu.core_type<tc>} {
    %0 = tpu.iota {dimensions = array<i32: 1>} : vector<8x64xi32>
    %c0 = arith.constant 0 : index
    %c0_0 = arith.constant 0 : index
    %1 = vector.load %arg0[%c0, %c0_0] : memref<8x1xi32, #tpu.memory_space<vmem>>, vector<8x1xi32>
    %2 = vector.broadcast %1 : vector<8x1xi32> to vector<8x64xi32>
    %3 = arith.cmpi eq, %0, %2 : vector<8x64xi32>
    %4 = arith.extui %3 : vector<8x64xi1> to vector<8x64xi32>
    %5 = arith.sitofp %4 : vector<8x64xi32> to vector<8x64xf32>
    %6 = arith.truncf %5 : vector<8x64xf32> to vector<8x64xbf16>
    %c0_1 = arith.constant 0 : index
    %c0_2 = arith.constant 0 : index
    %7 = vector.load %arg1[%c0_1, %c0_2] : memref<64x128xbf16, #tpu.memory_space<vmem>>, vector<64x128xbf16>
    %cst = arith.constant dense<0.000000e+00> : vector<8x128xf32>
    %8 = tpu.matmul %6, %7, %cst {dimension_numbers = #tpu.dot_dimension_numbers<[1], [0], [0], [1], [0, 0, 1, 1], [], []>} : vector<8x64xbf16>, vector<64x128xbf16>, vector<8x128xf32> -> vector<8x128xf32>
    %9 = arith.truncf %8 : vector<8x128xf32> to vector<8x128xbf16>
    %c0_3 = arith.constant 0 : index
    %c0_4 = arith.constant 0 : index
    %10 = vector.load %arg2[%c0_3, %c0_4] : memref<128x128xbf16, #tpu.memory_space<vmem>>, vector<128x128xbf16>
    %cst_5 = arith.constant dense<0.000000e+00> : vector<8x128xf32>
    %11 = tpu.matmul %9, %10, %cst_5 {dimension_numbers = #tpu.dot_dimension_numbers<[1], [0], [0], [1], [0, 0, 1, 1], [], []>} : vector<8x128xbf16>, vector<128x128xbf16>, vector<8x128xf32> -> vector<8x128xf32>
    %c0_6 = arith.constant 0 : index
    %c0_7 = arith.constant 0 : index
    %12 = vector.load %arg3[%c0_6, %c0_7] : memref<1x128xf32, #tpu.memory_space<vmem>>, vector<1x128xf32>
    %13 = vector.broadcast %12 : vector<1x128xf32> to vector<8x128xf32>
    %14 = arith.addf %11, %13 : vector<8x128xf32>
    %cst_8 = arith.constant 0.000000e+00 : f32
    %15 = vector.broadcast %cst_8 : f32 to vector<8x128xf32>
    %16 = arith.subf %15, %14 : vector<8x128xf32>
    %17 = math.exp %16 : vector<8x128xf32>
    %cst_9 = arith.constant 1.000000e+00 : f32
    %18 = vector.broadcast %cst_9 : f32 to vector<8x128xf32>
    %19 = arith.addf %18, %17 : vector<8x128xf32>
    %cst_10 = arith.constant 1.000000e+00 : f32
    %20 = vector.broadcast %cst_10 : f32 to vector<8x128xf32>
    %21 = arith.divf %20, %19 : vector<8x128xf32>
    %22 = arith.mulf %14, %21 : vector<8x128xf32>
    %23 = arith.truncf %22 : vector<8x128xf32> to vector<8x128xbf16>
    %c0_11 = arith.constant 0 : index
    %c0_12 = arith.constant 0 : index
    %24 = vector.load %arg4[%c0_11, %c0_12] : memref<128x128xbf16, #tpu.memory_space<vmem>>, vector<128x128xbf16>
    %cst_13 = arith.constant dense<0.000000e+00> : vector<8x128xf32>
    %25 = tpu.matmul %23, %24, %cst_13 {dimension_numbers = #tpu.dot_dimension_numbers<[1], [0], [0], [1], [0, 0, 1, 1], [], []>} : vector<8x128xbf16>, vector<128x128xbf16>, vector<8x128xf32> -> vector<8x128xf32>
    %c0_14 = arith.constant 0 : index
    %c0_15 = arith.constant 0 : index
    %26 = vector.load %arg5[%c0_14, %c0_15] : memref<1x128xf32, #tpu.memory_space<vmem>>, vector<1x128xf32>
    %27 = vector.broadcast %26 : vector<1x128xf32> to vector<8x128xf32>
    %28 = arith.addf %25, %27 : vector<8x128xf32>
    %cst_16 = arith.constant 0.000000e+00 : f32
    %29 = vector.broadcast %cst_16 : f32 to vector<8x128xf32>
    %30 = arith.subf %29, %28 : vector<8x128xf32>
    %31 = math.exp %30 : vector<8x128xf32>
    %cst_17 = arith.constant 1.000000e+00 : f32
    %32 = vector.broadcast %cst_17 : f32 to vector<8x128xf32>
    %33 = arith.addf %32, %31 : vector<8x128xf32>
    %34 = tpu.reciprocal %33 {approx = true} : vector<8x128xf32> -> vector<8x128xf32>
    %35 = arith.mulf %28, %34 : vector<8x128xf32>
    %c0_18 = arith.constant 0 : index
    %c0_19 = arith.constant 0 : index
    %36 = vector.load %arg6[%c0_18, %c0_19] : memref<8x128xf32, #tpu.memory_space<vmem>>, vector<8x128xf32>
    tpu.vector_store %arg6[%c0_18, %c0_19], %35 {strides = array<i32>} : memref<8x128xf32, #tpu.memory_space<vmem>>, vector<8x128xf32>,
    return
  }
}

</mosaic_0001>

<bundles_post_ra>
// kernel: tpu_custom_call.1
= control target key start
LH: loop header
LB: loop body
LE: loop exit
PB: predicated region body
PF: predicated region fallthrough
CT: control target
= control target key end

     0   :  { %11 = vsyncpa [#allocation3], 0  ;;  %s721_s0 = inlined_call_operand.vmem [shape: s32[8,1], index: 0, kind: input, shape index: {}]   ;;  %s722_s1 = inlined_call_operand.hbm [shape: bf16[64,128], index: 1, kind: input, shape index: {}]   ;;  %s723_s2 = inlined_call_operand.hbm [shape: bf16[128,128], index: 2, kind: input, shape index: {}]   ;;  %s724_s3 = inlined_call_operand.vmem [shape: f32[1,128], index: 3, kind: input, shape index: {}]   ;;  %s725_s4 = inlined_call_operand.hbm [shape: bf16[128,128], index: 4, kind: input, shape index: {}]   ;;  %s726_s5 = inlined_call_operand.vmem [shape: f32[1,128], index: 5, kind: input, shape index: {}]   ;;  %s727_s6 = inlined_call_operand.hbm [shape: f32[8,128], index: 6, kind: output, shape index: {}]  }
   0x1   :  { %12 = vsyncpa [#allocation6], 0 }
   0x2   :  { %13 = vsyncpa [#allocation4], 0  ;;  %s629_s21 = smov [#allocation5]   ;;  %s630_s23 = smov [#allocation2]  }
   0x3   :  { %s33_s22 = sshll.u32 %s629_s21, 4  ;;  %s21_s24 = sshll.u32 %s630_s23, 4  ;;  %s34_s22 = int_to_ptr.vmem [resolvable:$true] %s33_s22  ;;  %s22_s24 = int_to_ptr.vmem [resolvable:$true] %s21_s24 }
   0x4   :  { %s551_s25 = scalar_lea.vmem %s34_s22, 1024  ;;  %p556_p1 = scmp.lt.s32.totalorder %s34_s22, %s34_s22 }
   0x5   :  { %p552_p0 = scmp.ne.s32.totalorder %s34_s22, %s551_s25  ;;  %p557_p2 = scmp.lt.s32.totalorder %s551_s25, %s551_s25 }
   0x7   :  { %p558_p3 = por %p557_p2, %p556_p1 }
   0x9   :  { %p559_p4 = pnand %p558_p3, %p552_p0 }
   0xb   :  { %562 = shalt.err (!%p559_p4)
}
   0xc   :  { %s631_s26 = smov 64   ;;  %s632_s27 = smov 4  }
   0xd   :  { %39 = dma.hbm_to_vmem [thread:$0]  %s723_s2, 1024, %s34_s22, [#allocation6], %s631_s26, %s631_s26, %s632_s27  }
   0xe   :  { %s571_s30 = scalar_lea.vmem %s22_s24, 512  ;;  %p576_p6 = scmp.lt.s32.totalorder %s22_s24, %s22_s24 }
   0xf   :  { %p572_p5 = scmp.ne.s32.totalorder %s22_s24, %s571_s30  ;;  %p577_p7 = scmp.lt.s32.totalorder %s571_s30, %s571_s30 }
  0x11   :  { %p578_p8 = por %p577_p7, %p576_p6 }
  0x13   :  { %p579_p9 = pnand %p578_p8, %p572_p5 }
  0x15   :  { %582 = shalt.err (!%p579_p9)
}
  0x16   :  { %27 = dma.hbm_to_vmem [thread:$0]  %s722_s1, 512, %s22_s24, [#allocation3], %s631_s26, %s631_s26, %s632_s27  }
  0x17   :  { %s633_s9 = smov [#allocation7]  }
  0x18   :  { %s47_s10 = sshll.u32 %s633_s9, 4  ;;  %s48_s10 = int_to_ptr.vmem [resolvable:$true] %s47_s10 }
  0x19   :  { %s591_s11 = scalar_lea.vmem %s48_s10, 1024  ;;  %p596_p11 = scmp.lt.s32.totalorder %s48_s10, %s48_s10 }
  0x1a   :  { %p592_p10 = scmp.ne.s32.totalorder %s48_s10, %s591_s11  ;;  %p597_p12 = scmp.lt.s32.totalorder %s591_s11, %s591_s11 }
  0x1c   :  { %p598_p13 = por %p597_p12, %p596_p11 }
  0x1e   :  { %p599_p0 = pnand %p598_p13, %p592_p10 }
  0x20   :  { %602 = shalt.err (!%p599_p0)
}
  0x21   :  { %53 = dma.hbm_to_vmem [thread:$0]  %s725_s4, 1024, %s48_s10, [#allocation6], %s631_s26, %s631_s26, %s632_s27  }
  0x22   :  { %623 = dma.done.wait [#allocation3], 512  }
  0x23   :  { %624 = vsyncadd [#allocation3], 4294966784 }
  0x24   :  { %625 = dma.done.wait [#allocation6], 2048  }
  0x25   :  { %626 = vsyncadd [#allocation6], 4294965248  ;;  %v634_v0 = vmov 0   ;;  %v635_v1 = vmov 0.0   ;;  %v68_v2 = vld [vmem:[%s721_s0] sm:$0xff]  ;;  %vm636_vm0 = vmmov 0   ;;  %v66_v14 = vlaneseq }
  0x26   :  { %514 = vset.pattern.permute.xlu0 %v634_v0  ;;  %453 = vmatprep.subr.bf16.mxu0 %v635_v1  ;;  %v515_v3 = vld [vmem:[#allocation2 + $0x18] sm:$0xff]   ;;  %v516_v4 = vld [vmem:[#allocation2 + $0x10] sm:$0xff]   ;;  %v517_v6 = vld [vmem:[#allocation2 + $0x8] sm:$0xff]   ;;  %vm108_vm2 = vcmask 523264  }
  0x27   :  { %465 = vmatprep.subr.bf16.mxu1 %v635_v1  ;;  %461 = vmatprep.mubr.msk.bf16.mxu0 %vm636_vm0, %v635_v1  ;;  %v519_v5 = vld [vmem:[#allocation5 + $0x38] sm:$0xff]   ;;  %v520_v7 = vld [vmem:[#allocation5 + $0x30] sm:$0xff]   ;;  %v518_v8 = vld [vmem:[#allocation2] sm:$0xff]   ;;  %v67_v15 = vand.u32 127, %v66_v14 }
  0x28   :  { %481 = vmatprep.mubr.msk.bf16.mxu1 %vm636_vm0, %v635_v1  ;;  %70 = vperm.xlu0 %514, %v68_v2   ;;  %v521_v9 = vld [vmem:[#allocation5 + $0x28] sm:$0xff]   ;;  %v522_v10 = vld [vmem:[#allocation5 + $0x20] sm:$0xff]   ;;  %v523_v11 = vld [vmem:[#allocation5 + $0x18] sm:$0xff]  }
  0x29   :  { %454 = vmatpush3.bf16.msra.mxu0 %v515_v3  ;;  %466 = vmatpush3.bf16.msra.mxu1 %v519_v5  ;;  %v524_v12 = vld [vmem:[#allocation5 + $0x10] sm:$0xff]   ;;  %v525_v13 = vld [vmem:[#allocation5 + $0x8] sm:$0xff]   ;;  %v526_v19 = vld [vmem:[#allocation5] sm:$0xff]  }
  0x2a   :  { %455 = vmatprep.subr.bf16.mxu0 %v635_v1  ;;  %467 = vmatprep.subr.bf16.mxu1 %v635_v1  ;;  %v527_v25 = vld [vmem:[#allocation7 + $0x38] sm:$0xff]   ;;  %v528_v26 = vld [vmem:[#allocation7 + $0x30] sm:$0xff]   ;;  %v529_v27 = vld [vmem:[#allocation7 + $0x28] sm:$0xff]  }
  0x2b   :  { %v530_v28 = vld [vmem:[#allocation7 + $0x20] sm:$0xff]   ;;  %v531_v29 = vld [vmem:[#allocation7 + $0x18] sm:$0xff]   ;;  %v532_v30 = vld [vmem:[#allocation7 + $0x10] sm:$0xff]  }
  0x2c   :  { %v533_v31 = vld [vmem:[#allocation7 + $0x8] sm:$0xff]   ;;  %v534_v32 = vld [vmem:[#allocation7] sm:$0xff]  }
  0x2d   :  { %456 = vmatpush3.bf16.msra.mxu0 %v516_v4  ;;  %468 = vmatpush3.bf16.msra.mxu1 %v520_v7  ;;  %v412_v33 = vld [vmem:[%s724_s3] ss:$0 sm:$0xff]  ;;  %s637_s3 = smov [#allocation8]  }
  0x2e   :  { %457 = vmatprep.subr.bf16.mxu0 %v635_v1  ;;  %469 = vmatprep.subr.bf16.mxu1 %v635_v1  ;;  %v421_v46 = vld [vmem:[%s726_s5] ss:$0 sm:$0xff]  ;;  %s396_s16 = sshll.u32 %s637_s3, 4  ;;  %s397_s16 = int_to_ptr.vmem [resolvable:$true] %s396_s16 }
  0x2f   :  { %s603_s17 = scalar_lea.vmem %s397_s16, 128  ;;  %p608_p2 = scmp.lt.s32.totalorder %s397_s16, %s397_s16 }
  0x30   :  { %p604_p1 = scmp.ne.s32.totalorder %s397_s16, %s603_s17  ;;  %p609_p3 = scmp.lt.s32.totalorder %s603_s17, %s603_s17 }
  0x31   :  { %458 = vmatpush3.bf16.msra.mxu0 %v517_v6  ;;  %470 = vmatpush3.bf16.msra.mxu1 %v521_v9 }
  0x32   :  { %459 = vmatprep.subr.bf16.mxu0 %v635_v1  ;;  %471 = vmatprep.subr.bf16.mxu1 %v635_v1  ;;  %p610_p4 = por %p609_p3, %p608_p2 }
  0x34   :  { %p611_p5 = pnand %p610_p4, %p604_p1 }
  0x35   :  { %460 = vmatpush3.bf16.msra.mxu0 %v518_v8  ;;  %472 = vmatpush3.bf16.msra.mxu1 %v522_v10 }
  0x36   :  { %485 = vmatprep.subr.bf16.mxu0 %v635_v1  ;;  %473 = vmatprep.subr.bf16.mxu1 %v635_v1 }
  0x39   :  { %474 = vmatpush3.bf16.msra.mxu1 %v523_v11 }
  0x3a   :  { %475 = vmatprep.subr.bf16.mxu1 %v635_v1 }
  0x3d   :  { %476 = vmatpush3.bf16.msra.mxu1 %v524_v12 }
  0x3e   :  { %477 = vmatprep.subr.bf16.mxu1 %v635_v1 }
  0x41   :  { %478 = vmatpush3.bf16.msra.mxu1 %v525_v13 }
  0x42   :  { %479 = vmatprep.subr.bf16.mxu1 %v635_v1 }
  0x45   :  { %480 = vmatpush3.bf16.msra.mxu1 %v526_v19 }
  0xa3   :  { %v71_v16 = vpop.permute.xlu0 %70 }
  0xa4   :  { %vm72_vm1 = vcmp.eq.s32.totalorder %v67_v15, %v71_v16 }
  0xa5   :  { %v406_v17 = vsel %vm72_vm1, 1.0, %v635_v1 }
  0xa6   :  { %v75_v18 = vpack.c.bf16 %v406_v17, %v406_v17 }
  0xa8   :  { %462 = vmatmul.mubr.msk.bf16.vlgmr.msra.gmra.mxu0 %vm108_vm2, %v75_v18 }
  0xa9   :  { %501 = vmatprep.mubr.msk.bf16.mxu0 %vm636_vm0, %v635_v1  ;;  %486 = vmatpush3.bf16.msra.mxu0 %v527_v25 }
  0xaa   :  { %487 = vmatprep.subr.bf16.mxu0 %v635_v1 }
  0xad   :  { %488 = vmatpush3.bf16.msra.mxu0 %v528_v26 }
  0xae   :  { %489 = vmatprep.subr.bf16.mxu0 %v635_v1 }
  0xb1   :  { %490 = vmatpush3.bf16.msra.mxu0 %v529_v27 }
  0xb2   :  { %491 = vmatprep.subr.bf16.mxu0 %v635_v1 }
  0xb5   :  { %492 = vmatpush3.bf16.msra.mxu0 %v530_v28 }
  0xb6   :  { %493 = vmatprep.subr.bf16.mxu0 %v635_v1 }
  0xb9   :  { %494 = vmatpush3.bf16.msra.mxu0 %v531_v29 }
  0xba   :  { %495 = vmatprep.subr.bf16.mxu0 %v635_v1 }
  0xbd   :  { %496 = vmatpush3.bf16.msra.mxu0 %v532_v30 }
  0xbe   :  { %497 = vmatprep.subr.bf16.mxu0 %v635_v1 }
  0xc1   :  { %498 = vmatpush3.bf16.msra.mxu0 %v533_v31 }
  0xc2   :  { %499 = vmatprep.subr.bf16.mxu0 %v635_v1 }
  0xc5   :  { %500 = vmatpush3.bf16.msra.mxu0 %v534_v32 }
 0x168   :  { %v146_v20 = vpop.f32.mrf.mxu0 }
 0x169   :  { %v152_v21 = vpack.c.bf16 %v146_v20, %v146_v20 }
 0x16a   :  { %v463_v22 = vpop.f32.mrf.mxu0 }
 0x16b   :  { %482 = vmatmul.mubr.bf16.vlgmr.msra.gmra.mxu1 %v152_v21 }
 0x16c   :  { %v149_v23 = vpop.f32.mrf.mxu0 }
 0x16e   :  { %v464_v24 = vpop.f32.mrf.mxu0 }
 0x22b   :  { %v258_v34 = vpop.f32.mrf.mxu1 }
 0x22c   :  { %v259_v35 = vadd.f32 %v412_v33, %v258_v34 }
 0x22d   :  { %v483_v36 = vpop.f32.mrf.mxu1 }
 0x22e   :  { %v264_v37 = vsub.f32 0.0, %v259_v35 }
 0x22f   :  { %v261_v38 = vpop.f32.mrf.mxu1 }
 0x230   :  { %v265_v39 = vmul.f32 1.442695, %v264_v37 }
 0x231   :  { %v484_v40 = vpop.f32.mrf.mxu1 }
 0x232   :  { %535 = vpow2.f32 %v265_v39 }
 0x23f   :  { %v536_v41 = vpop.eup %535 }
 0x240   :  { %v267_v42 = vadd.f32 1.0, %v536_v41 }
 0x242   :  { %537 = vrcp.f32 %v267_v42 }
 0x24f   :  { %v538_v43 = vpop.eup %537 }
 0x250   :  { %v270_v44 = vmul.f32 %v538_v43, %v259_v35 }
 0x252   :  { %v271_v45 = vpack.c.bf16 %v270_v44, %v270_v44 }
 0x254   :  { %502 = vmatmul.mubr.bf16.vlgmr.msra.gmra.mxu0 %v271_v45 }
 0x314   :  { %v377_v47 = vpop.f32.mrf.mxu0 }
 0x315   :  { %v378_v48 = vadd.f32 %v421_v46, %v377_v47 }
 0x316   :  { %v503_v49 = vpop.f32.mrf.mxu0 }
 0x317   :  { %v383_v50 = vsub.f32 0.0, %v378_v48 }
 0x318   :  { %v380_v51 = vpop.f32.mrf.mxu0 }
 0x319   :  { %v384_v52 = vmul.f32 1.442695, %v383_v50 }
 0x31a   :  { %v504_v53 = vpop.f32.mrf.mxu0 }
 0x31b   :  { %539 = vpow2.f32 %v384_v52 }
 0x328   :  { %v540_v54 = vpop.eup %539 }
 0x329   :  { %v386_v55 = vadd.f32 1.0, %v540_v54 }
 0x32b   :  { %541 = vrcp.f32 %v386_v55 }
 0x338   :  { %v542_v56 = vpop.eup %541 }
 0x339   :  { %v388_v57 = vmul.f32 %v542_v56, %v378_v48 }
 0x33b   :  { %389 = vst [vmem:[#allocation8] sm:$0xff] %v388_v57 }
 0x33c   :  { %614 = shalt.err (!%p611_p5)
}
 0x33d   :  { %399 = dma.vmem_to_hbm [thread:$0]  %s397_s16, 128, %s727_s6, [#allocation4]  }
 0x33e   :  { %627 = dma.done.wait [#allocation4], 128  }
 0x33f   :  { %628 = vsyncadd [#allocation4], 4294967168 }
 0x340   :  { %403 = vsyncpa [#allocation3], 1 }
 0x341   :  { %404 = vsyncpa [#allocation6], 1 }
 0x342   :  { %405 = vsyncpa [#allocation4], 1 }

</bundles_post_ra>
